<compile_context>
chip_gen: v7x
topology: tpu7x:2x2x1
jax: 0.10.0
libtpu: 0.0.40
codegen_flags: <defaults>
</compile_context>

<pallas_src>
import jax
import jax.numpy as jnp
from jax.experimental import pallas as pl
from jax.experimental.pallas import tpu as pltpu


def dense_poly_kernel(c0_ref, c1_ref, cs_ref, x_ref, o_ref):
    """out[b] = c0 + d2[b] + sum_k x[k,b] * (c1[k] + s3[k,b]);  batch on lanes."""
    xT = x_ref[...]                                   # (N, TB) f32, batch on the lane axis
    N, TB = xT.shape
    xb = xT.astype(jnp.bfloat16)                      # MXU / outer-product operand

    # All degree-2 monomials, built directly in bf16 from the rounded xb:
    #   xx[i*N + j, b] = xb[i, b] * xb[j, b]
    # (N, N, TB) -> (N*N, TB) merges leading dims; TB stays on lanes -> no lane relayout.
    xx = (xb[:, None, :] * xb[None, :, :]).reshape(N * N, TB)

    # Single stacked MXU contraction, deep K = N*N, f32 accumulation:
    #   rows 0..N-1 : s3[k, b] = sum_ij c3[i,j,k] x_i x_j   (degree-3 partial)
    #   row  N      : d2[b]    = sum_ij c2[i,j]   x_i x_j   (degree-2, fully contracted)
    s = jnp.dot(cs_ref[...], xx, preferred_element_type=jnp.float32)   # (N+1, TB) f32
    s3 = s[:N, :]
    d2 = s[N:N + 1, :]

    # Fuse degrees 1 and 3 into one k-reduction.  k sits on the rhs sublanes, so
    # ones @ acc is the MXU-native form and yields the lane-dense (1, TB) row.
    acc = xT * (c1_ref[...] + s3)                                      # (N, TB) f32
    ones_row = jnp.ones((1, N), dtype=jnp.float32)
    row = jnp.dot(ones_row, acc, preferred_element_type=jnp.float32)   # (1, TB)
    o_ref[...] = c0_ref[0] + d2 + row                                  # lane-dense store


def prepare_dense_poly_coeffs(c0, c1, c2, c3):
    """One-time coefficient prep (cast / transpose / stack), outside the per-call path."""
    N = c1.shape[0]
    c0s = jnp.reshape(c0, (1,)).astype(jnp.float32)                  # SMEM scalar
    c1c = jnp.reshape(c1, (N, 1)).astype(jnp.float32)                # degree-1 stays f32-exact
    c3_kij = jnp.transpose(c3, (2, 0, 1)).reshape(N, N * N)          # [k, i*N+j] = c3[i,j,k]
    c2_row = jnp.reshape(c2, (1, N * N))                             # [0, i*N+j] = c2[i,j]
    cstack = jnp.concatenate([c3_kij, c2_row], axis=0).astype(jnp.bfloat16)  # (N+1, N*N)
    return c0s, c1c, cstack


def _round_up(v, m):
    return ((v + m - 1) // m) * m


def _vmem_ceiling_bytes():
    # Generation-aware cap: ~48 MiB on v7x (64 MiB/TC), ~96 MiB on v5e/v6e (128 MiB).
    try:
        cap = int(getattr(pltpu.get_tpu_info(), "vmem_capacity_bytes", 64 * 2**20))
    except Exception:
        cap = 64 * 2**20
    return (3 * cap) // 4


@jax.jit
def dense_polynomial(x, c0s, c1c, cstack):
    B, N = x.shape
    x = x.astype(jnp.float32)

    # Batch tile lives on the LANE axis: keep it a multiple of 128 and large enough
    # (~512) to amortize the ~0.35us per-grid-step overhead.
    lanes = 128
    b_lanes = _round_up(max(B, 1), lanes)
    TB = min(512, b_lanes)
    num_tiles = pl.cdiv(b_lanes, TB)
    if num_tiles > 1 and num_tiles % 2:
        # v7x megacore (2 TCs): best-effort even tile count so ("parallel",) splits evenly.
        TB = max(lanes, _round_up(pl.cdiv(b_lanes, num_tiles + 1), lanes))
        num_tiles = pl.cdiv(b_lanes, TB)
    B_pad = num_tiles * TB

    # Batch-on-lanes layout: x^T has shape (N, B_pad).  Padded columns are zero, so
    # they just evaluate to c0 and are sliced off below.
    xT = jnp.pad(x, ((0, B_pad - B), (0, 0))).T

    # VMEM budget: residents (x2 for pipeline double-buffering), streamed x/out blocks
    # (x2 buffers) and the in-kernel xx / xb / s / acc intermediates, with 2x headroom,
    # capped at 75% of this generation's physical VMEM.
    resident = c1c.size * 4 + cstack.size * 2
    stream = 2 * (N * TB * 4) + 2 * (TB * 4)
    interm = N * N * TB * 2 + N * TB * 2 + (N + 1) * TB * 4 + N * TB * 4
    vmem_limit = int(min(_vmem_ceiling_bytes(),
                         max(32 * 2**20, 2 * (2 * resident + stream + interm))))

    grid_spec = pltpu.PrefetchScalarGridSpec(
        num_scalar_prefetch=0,
        grid=(num_tiles,),
        in_specs=[
            pl.BlockSpec(memory_space=pltpu.MemorySpace.SMEM),     # c0 (1,)
            pl.BlockSpec((N, 1), lambda b: (0, 0)),                # c1 (N,1): VMEM-resident
            pl.BlockSpec((N + 1, N * N), lambda b: (0, 0)),        # [c3_(k,ij); c2_flat]: resident
            pl.BlockSpec((N, TB), lambda b: (0, b)),               # x^T streams over batch lanes
        ],
        out_specs=pl.BlockSpec((1, TB), lambda b: (0, b)),         # lane-dense (1, B_pad)
    )

    out_row = pl.pallas_call(
        dense_poly_kernel,
        out_shape=jax.ShapeDtypeStruct((1, B_pad), jnp.float32),
        grid_spec=grid_spec,
        compiler_params=pltpu.CompilerParams(
            dimension_semantics=("parallel",),
            vmem_limit_bytes=vmem_limit,
        ),
    )(c0s, c1c, cstack, xT)

    # (1, B_pad) lane-dense slab -> (B, 1), matching the PyTorch module output.
    return out_row[0, :B][:, None]


def reference_f32(x, c0, c1, c2, c3):
    d1 = jnp.einsum('i,bi->b', c1, x)
    d2 = jnp.einsum('ij,bi,bj->b', c2, x, x)
    d3 = jnp.einsum('ijk,bi,bj,bk->b', c3, x, x, x)
    return (c0 + d1 + d2 + d3)[:, None]


def reference_bf16_matched(x, c0, c1, c2, c3):
    # Same operand rounding as the kernel: x, c2, c3 and the (x_i x_j) monomials are
    # bf16; the degree-1 term and the final k-factor stay f32; accumulation in f32.
    f32 = jnp.float32
    xb = x.astype(jnp.bfloat16)
    xx = (xb[:, :, None] * xb[:, None, :]).astype(f32)     # bf16 products, like the kernel
    c2b = c2.astype(jnp.bfloat16).astype(f32)
    c3b = c3.astype(jnp.bfloat16).astype(f32)
    d1 = jnp.einsum('i,bi->b', c1, x)
    d2 = jnp.einsum('ij,bij->b', c2b, xx)
    d3 = jnp.einsum('ijk,bij,bk->b', c3b, xx, x)
    return (c0 + d1 + d2 + d3)[:, None]


if __name__ == "__main__":
    B, N = 8, 32
    key = jax.random.PRNGKey(0)
    kx, k0, k1, k2, k3 = jax.random.split(key, 5)

    x = jax.random.normal(kx, (B, N), dtype=jnp.float32)
    c0 = jax.random.normal(k0, (), dtype=jnp.float32)
    c1 = jax.random.normal(k1, (N,), dtype=jnp.float32) * 0.1
    c2 = jax.random.normal(k2, (N, N), dtype=jnp.float32) * 0.01
    c3 = jax.random.normal(k3, (N, N, N), dtype=jnp.float32) * 0.001

    coeffs = prepare_dense_poly_coeffs(c0, c1, c2, c3)   # one-time cast / transpose / stack
    out = dense_polynomial(x, *coeffs)
    out = jax.block_until_ready(out)

    assert out.shape == (B, 1), out.shape
    # Tight check vs. a reference using the same bf16 operand/monomial rounding as the kernel.
    ref_m = reference_bf16_matched(x, c0, c1, c2, c3)
    assert jnp.allclose(out, ref_m, rtol=2e-3, atol=2e-3), (out, ref_m)
    # Looser sanity check vs. the pure f32 einsum reference (bf16 quantization only).
    ref_f = reference_f32(x, c0, c1, c2, c3)
    assert jnp.allclose(out, ref_f, rtol=2e-2, atol=2e-2), (out, ref_f)

    print("KERNEL_OK")
</pallas_src>

<mosaic_0001>
module attributes {stable_mosaic.version = 11 : i64} {
  func.func @dense_poly_kernel(%arg0: i32, %arg1: memref<1xf32, #tpu.memory_space<smem>>, %arg2: memref<32x1xf32, #tpu.memory_space<vmem>>, %arg3: memref<33x1024xbf16, #tpu.memory_space<vmem>>, %arg4: memref<32x128xf32, #tpu.memory_space<vmem>>, %arg5: memref<1x128xf32, #tpu.memory_space<vmem>>) attributes {dimension_semantics = [#tpu.dimension_semantics<parallel>], iteration_bounds = array<i64: 1>, scalar_prefetch = 0 : i64, scratch_operands = 0 : i64, tpu.core_type = #tpu.core_type<tc>, window_params = [{transform_indices = @transform_0, window_bounds = array<i64: 1>}, {pipeline_mode = #tpu.pipeline_mode<synchronous>, transform_indices = @transform_1, window_bounds = array<i64: 32, 1>}, {pipeline_mode = #tpu.pipeline_mode<synchronous>, transform_indices = @transform_2, window_bounds = array<i64: 33, 1024>}, {transform_indices = @transform_3, window_bounds = array<i64: 32, 128>}, {transform_indices = @transform_4, window_bounds = array<i64: 1, 128>}]} {
    %c0 = arith.constant 0 : index
    %c0_0 = arith.constant 0 : index
    %0 = vector.load %arg4[%c0, %c0_0] : memref<32x128xf32, #tpu.memory_space<vmem>>, vector<32x128xf32>
    %1 = arith.truncf %0 : vector<32x128xf32> to vector<32x128xbf16>
    %2 = vector.shape_cast %1 : vector<32x128xbf16> to vector<32x1x128xbf16>
    %3 = vector.shape_cast %1 : vector<32x128xbf16> to vector<1x32x128xbf16>
    %4 = vector.broadcast %2 : vector<32x1x128xbf16> to vector<32x32x128xbf16>
    %5 = vector.broadcast %3 : vector<1x32x128xbf16> to vector<32x32x128xbf16>
    %6 = arith.mulf %4, %5 : vector<32x32x128xbf16>
    %7 = vector.shape_cast %6 : vector<32x32x128xbf16> to vector<1024x128xbf16>
    %c0_1 = arith.constant 0 : index
    %c0_2 = arith.constant 0 : index
    %8 = vector.load %arg3[%c0_1, %c0_2] : memref<33x1024xbf16, #tpu.memory_space<vmem>>, vector<33x1024xbf16>
    %cst = arith.constant dense<0.000000e+00> : vector<33x128xf32>
    %9 = tpu.matmul %8, %7, %cst {dimension_numbers = #tpu.dot_dimension_numbers<[1], [0], [0], [1], [0, 0, 1, 1], [], []>} : vector<33x1024xbf16>, vector<1024x128xbf16>, vector<33x128xf32> -> vector<33x128xf32>
    %10 = vector.extract_strided_slice %9 {offsets = [0, 0], sizes = [32, 128], strides = [1, 1]} : vector<33x128xf32> to vector<32x128xf32>
    %11 = vector.extract_strided_slice %9 {offsets = [32, 0], sizes = [1, 128], strides = [1, 1]} : vector<33x128xf32> to vector<1x128xf32>
    %c0_3 = arith.constant 0 : index
    %c0_4 = arith.constant 0 : index
    %12 = vector.load %arg2[%c0_3, %c0_4] : memref<32x1xf32, #tpu.memory_space<vmem>>, vector<32x1xf32>
    %13 = vector.broadcast %12 : vector<32x1xf32> to vector<32x128xf32>
    %14 = arith.addf %13, %10 : vector<32x128xf32>
    %15 = arith.mulf %0, %14 : vector<32x128xf32>
    %cst_5 = arith.constant 1.000000e+00 : f32
    %16 = vector.broadcast %cst_5 : f32 to vector<1x32xf32>
    %cst_6 = arith.constant dense<0.000000e+00> : vector<1x128xf32>
    %17 = tpu.matmul %16, %15, %cst_6 {dimension_numbers = #tpu.dot_dimension_numbers<[1], [0], [0], [1], [0, 0, 1, 1], [], []>} : vector<1x32xf32>, vector<32x128xf32>, vector<1x128xf32> -> vector<1x128xf32>
    %c0_7 = arith.constant 0 : index
    %18 = memref.load %arg1[%c0_7] : memref<1xf32, #tpu.memory_space<smem>>
    %19 = vector.broadcast %18 : f32 to vector<1x128xf32>
    %20 = arith.addf %19, %11 : vector<1x128xf32>
    %21 = arith.addf %20, %17 : vector<1x128xf32>
    %c0_8 = arith.constant 0 : index
    %c0_9 = arith.constant 0 : index
    %22 = vector.load %arg5[%c0_8, %c0_9] : memref<1x128xf32, #tpu.memory_space<vmem>>, vector<1x128xf32>
    tpu.vector_store %arg5[%c0_8, %c0_9], %21 {strides = array<i32>} : memref<1x128xf32, #tpu.memory_space<vmem>>, vector<1x128xf32>,
    return
  }
  func.func @transform_0(%arg0: i32) -> i32 {
    %c0_i32 = arith.constant 0 : i32
    %c0_i32_0 = arith.constant 0 : i32
    return %c0_i32 : i32
  }
  func.func @transform_1(%arg0: i32) -> (i32, i32) {
    %c0_i32 = arith.constant 0 : i32
    %c0_i32_0 = arith.constant 0 : i32
    %c0_i32_1 = arith.constant 0 : i32
    return %c0_i32, %c0_i32_0 : i32, i32
  }
  func.func @transform_2(%arg0: i32) -> (i32, i32) {
    %c0_i32 = arith.constant 0 : i32
    %c0_i32_0 = arith.constant 0 : i32
    %c0_i32_1 = arith.constant 0 : i32
    return %c0_i32, %c0_i32_0 : i32, i32
  }
  func.func @transform_3(%arg0: i32) -> (i32, i32) {
    %c0_i32 = arith.constant 0 : i32
    %c0_i32_0 = arith.constant 0 : i32
    return %c0_i32, %arg0 : i32, i32
  }
  func.func @transform_4(%arg0: i32) -> (i32, i32) {
    %c0_i32 = arith.constant 0 : i32
    %c0_i32_0 = arith.constant 0 : i32
    return %c0_i32, %arg0 : i32, i32
  }
}

</mosaic_0001>

<bundles_post_ra>
// kernel: dense_polynomial.1
= control target key start
LH: loop header
LB: loop body
LE: loop exit
PB: predicated region body
PF: predicated region fallthrough
CT: control target
= control target key end

     0   :  { %10 = vsyncpa [#allocation4], 0  ;;  %s1331_s15 = smov [#allocation3]   ;;  %s1720_s0 = inlined_call_operand.<no memory space> [shape: f32[1], index: 0, kind: input, shape index: {}]   ;;  %s1721_s1 = inlined_call_operand.vmem [shape: f32[32,1], index: 1, kind: input, shape index: {}]   ;;  %s1722_s2 = inlined_call_operand.hbm [shape: bf16[33,1024], index: 2, kind: input, shape index: {}]   ;;  %s1723_s3 = inlined_call_operand.vmem [shape: f32[32,128], index: 3, kind: input, shape index: {}]   ;;  %s1724_s4 = inlined_call_operand.vmem [shape: f32[1,128], index: 4, kind: output, shape index: {}]  }
   0x1   :  { %s20_s16 = sshll.u32 %s1331_s15, 4  ;;  %s1307_s19 = scalar_lea.hbm %s1722_s2, 2560  ;;  %s21_s16 = int_to_ptr.vmem [resolvable:$true] %s20_s16 }
   0x2   :  { %p1308_p0 = scmp.ne.s32.totalorder %s1722_s2, %s1307_s19  ;;  %p1311_p1 = scmp.lt.u32.totalorder %s1307_s19, %s1722_s2 }
   0x4   :  { %p1313_p2 = pnand %p1311_p1, %p1308_p0 }
   0x6   :  { %1316 = shalt.err (!%p1313_p2)
}
   0x7   :  { %s1317_s24 = scalar_lea.vmem %s21_s16, 2560  ;;  %p1322_p4 = scmp.lt.s32.totalorder %s21_s16, %s21_s16 }
   0x8   :  { %p1318_p3 = scmp.ne.s32.totalorder %s21_s16, %s1317_s24  ;;  %p1323_p5 = scmp.lt.s32.totalorder %s1317_s24, %s1317_s24 }
   0xa   :  { %p1324_p6 = por %p1323_p5, %p1322_p4 }
   0xc   :  { %p1325_p7 = pnand %p1324_p6, %p1318_p3 }
   0xe   :  { %1328 = shalt.err (!%p1325_p7)
}
   0xf   :  { %s1332_s25 = smov 512   ;;  %s1333_s26 = smov 32  }
  0x10   :  { %26 = dma.hbm_to_vmem [thread:$0]  %s1722_s2, 2560, %s21_s16, [#allocation4], %s1332_s25, %s1332_s25, %s1333_s26  }
  0x11   :  { %1329 = dma.done.wait [#allocation4], 2560  }
  0x12   :  { %1330 = vsyncadd [#allocation4], 4294964736  ;;  %v45_v0 = vlaneseq  ;;  %v1334_v1 = vmov 1966171168   ;;  %v1335_v3 = vmov 0   ;;  %v1382_v7 = vld [vmem:[%s1723_s3] sm:$0xff] }
  0x13   :  { %v43_v2 = vunpack.c.l.s4 %v1334_v1  ;;  %1297 = vset.pattern.permute.xlu0 %v1335_v3  ;;  %1298 = vset.pattern.permute.xlu1 %v1335_v3  ;;  %v1387_v8 = vld [vmem:[%s1723_s3 + $0x8] sm:$0xff]  ;;  %v1392_v9 = vld [vmem:[%s1723_s3 + $0x10] sm:$0xff]  ;;  %v1403_v12 = vld [vmem:[%s1723_s3 + $0x18] sm:$0xff]  ;;  %vm1337_vm0 = vmmov 0   ;;  %vm1003_vm1 = vcmask 261120  }
  0x14   :  { %v46_v4 = vshrl.u32 %v45_v0, 7  ;;  %v1396_v10 = vpack.c.bf16 %v1387_v8, %v1382_v7  ;;  %v1087_v11 = vpack.c.bf16 %v1387_v8, %v1387_v8  ;;  %v1405_v13 = vld [vmem:[#allocation3] sm:$0xff]  ;;  %v1411_v15 = vpack.c.bf16 %v1403_v12, %v1392_v9  ;;  %v1415_v17 = vld [vmem:[#allocation3 + $0x8] sm:$0xff]  ;;  %v973_v48 = vld [vmem:[%s1721_s1 + $0x10] sm:$0xff] }
  0x15   :  { %v44_v5 = vunpack.c.0.s8 %v43_v2  ;;  %v1407_v14 = vld [vmem:[#allocation3 + $0x20] sm:$0xff]  ;;  %v1417_v18 = vld [vmem:[#allocation3 + $0x28] sm:$0xff]  ;;  %v1088_v19 = vpack.c.bf16 %v1403_v12, %v1403_v12  ;;  %987 = vperm.xlu1 %1298, %v973_v48   ;;  %v974_v62 = vld [vmem:[%s1721_s1 + $0x18] sm:$0xff] }
  0x16   :  { %v1106_v16 = vcombine.high %v1405_v13, %v1407_v14  ;;  %v1421_v20 = vld [vmem:[#allocation3 + $0x40] sm:$0xff]  ;;  %v1108_v23 = vcombine.high %v1415_v17, %v1417_v18  ;;  %v1430_v25 = vld [vmem:[#allocation3 + $0x48] sm:$0xff]  ;;  %v1434_v27 = vsub.s32 0, %v46_v4  ;;  %v1105_v28 = vcombine.low %v1405_v13, %v1407_v14 }
  0x17   :  { %v1377_v6 = vsub.s32 %v44_v5, %v46_v4  ;;  %v1428_v24 = vld [vmem:[#allocation3 + $0x60] sm:$0xff]  ;;  %v1432_v26 = vld [vmem:[#allocation3 + $0x68] sm:$0xff]  ;;  %v1107_v29 = vcombine.low %v1415_v17, %v1417_v18 }
  0x18   :  { %779 = vmatprep.mubr.bf16.mxu0 %v1106_v16  ;;  %835 = vmatprep.mubr.bf16.mxu1 %v1108_v23  ;;  %v1114_v37 = vcombine.high %v1421_v20, %v1428_v24  ;;  %v1116_v38 = vcombine.high %v1430_v25, %v1432_v26  ;;  %v971_v47 = vld [vmem:[%s1721_s1] sm:$0xff]  ;;  %v972_v57 = vld [vmem:[%s1721_s1 + $0x8] sm:$0xff] }
  0x19   :  { %v48_v21 = vrot.slane %v1396_v10, %v1377_v6  ;;  %v55_v22 = vrot.slane %v1087_v11, %v1377_v6  ;;  %v1442_v30 = vrot.slane %v1411_v15, %v1377_v6  ;;  %v1451_v36 = vrot.slane %v1088_v19, %v1377_v6  ;;  %977 = vperm.xlu0 %1297, %v971_v47  }
  0x1a   :  { %992 = vperm.xlu1 %1298, %v974_v62  }
  0x1b   :  { %v56_v31 = vcombine.high %v48_v21, %v48_v21  ;;  %v64_v32 = vrot.slane %v48_v21, %v1377_v6  ;;  %v57_v33 = vcombine.high %v55_v22, %v55_v22  ;;  %v71_v34 = vrot.slane %v55_v22, %v1377_v6 }
  0x1c   :  { %v1448_v35 = vrot.slane %v1442_v30, %v1377_v6 }
  0x1d   :  { %v86_v39 = vcombine.high %v64_v32, %v64_v32  ;;  %v87_v40 = vcombine.high %v71_v34, %v71_v34  ;;  %v1089_v41 = vpack.i.b16 %v64_v32, %v64_v32  ;;  %v1093_v42 = vpack.i.b16 %v71_v34, %v71_v34  ;;  %982 = vperm.xlu0 %1297, %v972_v57  }
  0x1e   :  { %v140_v43 = vunpack.i.h.s16 %v64_v32  ;;  %v148_v44 = vunpack.i.h.s16 %v71_v34  ;;  %v1458_v45 = vrot.slane %v56_v31, %v1377_v6  ;;  %v1461_v46 = vrot.slane %v57_v33, %v1377_v6 }
  0x1f   :  { %v144_v49 = vunpack.i.h.s16 %v86_v39  ;;  %v1091_v50 = vpack.i.b16 %v86_v39, %v86_v39  ;;  %v152_v51 = vunpack.i.h.s16 %v87_v40  ;;  %v1095_v52 = vpack.i.b16 %v87_v40, %v87_v40 }
  0x20   :  { %v206_v53 = vrot.slane %v1089_v41, %v1434_v27  ;;  %v238_v54 = vrot.slane %v1093_v42, %v1434_v27  ;;  %v172_v55 = vpack.i.b16 %v140_v43, %v140_v43  ;;  %v180_v56 = vpack.i.b16 %v148_v44, %v148_v44 }
  0x21   :  { %v222_v58 = vrot.slane %v1091_v50, %v1434_v27  ;;  %v254_v59 = vrot.slane %v1095_v52, %v1434_v27  ;;  %v176_v60 = vpack.i.b16 %v144_v49, %v144_v49  ;;  %v184_v61 = vpack.i.b16 %v152_v51, %v152_v51 }
  0x22   :  { %v332_v63 = vpack.i.b16 %v206_v53, %v206_v53  ;;  %v388_v0 = vpack.i.b16 %v238_v54, %v238_v54  ;;  %v210_v1 = vrot.slane %v172_v55, %v1434_v27  ;;  %v242_v2 = vrot.slane %v180_v56, %v1434_v27 }
  0x23   :  { %v360_v3 = vpack.i.b16 %v222_v58, %v222_v58  ;;  %v416_v4 = vpack.i.b16 %v254_v59, %v254_v59  ;;  %v226_v5 = vrot.slane %v176_v60, %v1434_v27  ;;  %v258_v11 = vrot.slane %v184_v61, %v1434_v27 }
  0x24   :  { %v337_v16 = vrot.slane %v332_v63, %v1434_v27  ;;  %v393_v19 = vrot.slane %v388_v0, %v1434_v27  ;;  %v339_v21 = vpack.i.b16 %v210_v1, %v210_v1  ;;  %v395_v22 = vpack.i.b16 %v242_v2, %v242_v2 }
  0x25   :  { %v365_v23 = vrot.slane %v360_v3, %v1434_v27  ;;  %v421_v31 = vrot.slane %v416_v4, %v1434_v27  ;;  %v367_v32 = vpack.i.b16 %v226_v5, %v226_v5  ;;  %v423_v33 = vpack.i.b16 %v258_v11, %v258_v11 }
  0x26   :  { %v555_v34 = vmul.bf16 %v337_v16, %v1396_v10  ;;  %v571_v39 = vmul.bf16 %v393_v19, %v1396_v10  ;;  %v556_v40 = vmul.bf16 %v337_v16, %v1411_v15  ;;  %v572_v41 = vmul.bf16 %v393_v19, %v1411_v15 }
  0x27   :  { %v563_v42 = vmul.bf16 %v365_v23, %v1396_v10  ;;  %v579_v43 = vmul.bf16 %v421_v31, %v1396_v10  ;;  %v564_v44 = vmul.bf16 %v365_v23, %v1411_v15  ;;  %v580_v47 = vmul.bf16 %v421_v31, %v1411_v15 }
  0x28   :  { %v372_v48 = vrot.slane %v367_v32, %v1434_v27  ;;  %v428_v49 = vrot.slane %v423_v33, %v1434_v27  ;;  %v1498_v50 = vrot.slane %v339_v21, %v1434_v27  ;;  %v1501_v51 = vrot.slane %v395_v22, %v1434_v27 }
  0x29   :  { %1130 = vmatprep.subr.bf16.mxu0 %v563_v42  ;;  %1164 = vmatprep.subr.bf16.mxu1 %v579_v43  ;;  %v88_v52 = vcombine.high %v1458_v45, %v1458_v45  ;;  %v89_v53 = vcombine.high %v1461_v46, %v1461_v46  ;;  %v1090_v54 = vpack.i.b16 %v1458_v45, %v1458_v45  ;;  %v142_v55 = vunpack.i.h.s16 %v1458_v45 }
  0x2a   :  { %1131 = vmatpush3.bf16.msra.mxu0 %v555_v34  ;;  %1165 = vmatpush3.bf16.msra.mxu1 %v571_v39  ;;  %v565_v56 = vmul.bf16 %v372_v48, %v1396_v10  ;;  %v581_v57 = vmul.bf16 %v428_v49, %v1396_v10  ;;  %v557_v58 = vmul.bf16 %v1498_v50, %v1396_v10  ;;  %v150_v59 = vunpack.i.h.s16 %v1461_v46 }
  0x2b   :  { %1132 = vmatprep.subr.bf16.mxu0 %v564_v44  ;;  %1166 = vmatprep.subr.bf16.mxu1 %v580_v47  ;;  %v573_v60 = vmul.bf16 %v1501_v51, %v1396_v10  ;;  %v566_v61 = vmul.bf16 %v372_v48, %v1411_v15  ;;  %v582_v45 = vmul.bf16 %v428_v49, %v1411_v15  ;;  %v146_v62 = vunpack.i.h.s16 %v88_v52 }
  0x2c   :  { %v558_v63 = vmul.bf16 %v1498_v50, %v1411_v15  ;;  %v574_v0 = vmul.bf16 %v1501_v51, %v1411_v15  ;;  %v1092_v1 = vpack.i.b16 %v88_v52, %v88_v52  ;;  %v1096_v2 = vpack.i.b16 %v89_v53, %v89_v53 }
  0x2d   :  { %v214_v3 = vrot.slane %v1090_v54, %v1434_v27  ;;  %v1094_v4 = vpack.i.b16 %v1461_v46, %v1461_v46  ;;  %v178_v5 = vpack.i.b16 %v146_v62, %v146_v62  ;;  %v154_v11 = vunpack.i.h.s16 %v89_v53 }
  0x2e   :  { %1133 = vmatpush3.bf16.msra.mxu0 %v556_v40  ;;  %1167 = vmatpush3.bf16.msra.mxu1 %v572_v41  ;;  %v230_v16 = vrot.slane %v1092_v1, %v1434_v27  ;;  %v262_v19 = vrot.slane %v1096_v2, %v1434_v27  ;;  %v174_v21 = vpack.i.b16 %v142_v55, %v142_v55  ;;  %v156_v2 = vunpack.i.h.s16 %v1448_v35 }
  0x2f   :  { %1134 = vmatprep.subr.bf16.mxu0 %v565_v56  ;;  %1168 = vmatprep.subr.bf16.mxu1 %v581_v57  ;;  %v346_v22 = vpack.i.b16 %v214_v3, %v214_v3  ;;  %v246_v23 = vrot.slane %v1094_v4, %v1434_v27  ;;  %v234_v31 = vrot.slane %v178_v5, %v1434_v27 }
  0x30   :  { %v374_v32 = vpack.i.b16 %v230_v16, %v230_v16  ;;  %v430_v33 = vpack.i.b16 %v262_v19, %v262_v19  ;;  %v186_v34 = vpack.i.b16 %v154_v11, %v154_v11  ;;  %v218_v46 = vrot.slane %v174_v21, %v1434_v27 }
  0x31   :  { %v351_v39 = vrot.slane %v346_v22, %v1434_v27  ;;  %v402_v40 = vpack.i.b16 %v246_v23, %v246_v23  ;;  %v381_v41 = vpack.i.b16 %v234_v31, %v234_v31  ;;  %v182_v42 = vpack.i.b16 %v150_v59, %v150_v59 }
  0x32   :  { %1135 = vmatpush3.bf16.msra.mxu0 %v557_v58  ;;  %1169 = vmatpush3.bf16.msra.mxu1 %v573_v60  ;;  %v379_v43 = vrot.slane %v374_v32, %v1434_v27  ;;  %v435_v44 = vrot.slane %v430_v33, %v1434_v27  ;;  %v266_v47 = vrot.slane %v186_v34, %v1434_v27 }
  0x33   :  { %1136 = vmatprep.subr.bf16.mxu0 %v566_v61  ;;  %1170 = vmatprep.subr.bf16.mxu1 %v582_v45  ;;  %v407_v48 = vrot.slane %v402_v40, %v1434_v27  ;;  %v1538_v49 = vrot.slane %v1451_v36, %v1377_v6  ;;  %v1113_v50 = vcombine.low %v1421_v20, %v1428_v24 }
  0x34   :  { %v567_v51 = vmul.bf16 %v379_v43, %v1396_v10  ;;  %v583_v52 = vmul.bf16 %v435_v44, %v1396_v10  ;;  %v559_v53 = vmul.bf16 %v351_v39, %v1396_v10  ;;  %v560_v54 = vmul.bf16 %v351_v39, %v1411_v15 }
  0x35   :  { %v575_v55 = vmul.bf16 %v407_v48, %v1396_v10  ;;  %v568_v56 = vmul.bf16 %v379_v43, %v1411_v15  ;;  %v1549_v57 = vrot.slane %v381_v41, %v1434_v27  ;;  %v437_v58 = vpack.i.b16 %v266_v47, %v266_v47 }
  0x36   :  { %1137 = vmatpush3.bf16.msra.mxu0 %v558_v63  ;;  %1171 = vmatpush3.bf16.msra.mxu1 %v574_v0  ;;  %v353_v59 = vpack.i.b16 %v218_v46, %v218_v46  ;;  %v250_v60 = vrot.slane %v182_v42, %v1434_v27  ;;  %v135_v61 = vcombine.high %v1448_v35, %v1448_v35 }
  0x37   :  { %1138 = vmatprep.subr.bf16.mxu0 %v567_v51  ;;  %1172 = vmatprep.subr.bf16.mxu1 %v583_v52  ;;  %v584_v45 = vmul.bf16 %v435_v44, %v1411_v15  ;;  %v576_v62 = vmul.bf16 %v407_v48, %v1411_v15  ;;  %v442_v1 = vrot.slane %v437_v58, %v1434_v27 }
  0x38   :  { %v1559_v3 = vrot.slane %v353_v59, %v1434_v27  ;;  %v409_v63 = vpack.i.b16 %v250_v60, %v250_v60  ;;  %v1099_v0 = vpack.i.b16 %v135_v61, %v135_v61  ;;  %v136_v4 = vcombine.high %v1538_v49, %v1538_v49 }
  0x39   :  { %v569_v5 = vmul.bf16 %v1549_v57, %v1396_v10  ;;  %v570_v11 = vmul.bf16 %v1549_v57, %v1411_v15  ;;  %v1097_v16 = vpack.i.b16 %v1448_v35, %v1448_v35  ;;  %v1101_v19 = vpack.i.b16 %v1538_v49, %v1538_v49 }
  0x3a   :  { %1139 = vmatpush3.bf16.msra.mxu0 %v559_v53  ;;  %1173 = vmatpush3.bf16.msra.mxu1 %v575_v55  ;;  %v585_v21 = vmul.bf16 %v442_v1, %v1396_v10  ;;  %v414_v22 = vrot.slane %v409_v63, %v1434_v27  ;;  %v586_v23 = vmul.bf16 %v442_v1, %v1411_v15  ;;  %v160_v31 = vunpack.i.h.s16 %v135_v61 }
  0x3b   :  { %1140 = vmatprep.subr.bf16.mxu0 %v568_v56  ;;  %1174 = vmatprep.subr.bf16.mxu1 %v584_v45  ;;  %v286_v32 = vrot.slane %v1099_v0, %v1434_v27  ;;  %v1103_v33 = vpack.i.b16 %v136_v4, %v136_v4  ;;  %v270_v34 = vrot.slane %v1097_v16, %v1434_v27  ;;  %v168_v35 = vunpack.i.h.s16 %v136_v4 }
  0x3c   :  { %v561_v46 = vmul.bf16 %v1559_v3, %v1396_v10  ;;  %v577_v39 = vmul.bf16 %v414_v22, %v1396_v10  ;;  %v302_v40 = vrot.slane %v1101_v19, %v1434_v27  ;;  %v192_v41 = vpack.i.b16 %v160_v31, %v160_v31  ;;  %v1616_v31 = vld [vmem:[#allocation3 + $0x80] sm:$0x11] }
  0x3d   :  { %v472_v42 = vpack.i.b16 %v286_v32, %v286_v32  ;;  %v318_v43 = vrot.slane %v1103_v33, %v1434_v27  ;;  %v444_v44 = vpack.i.b16 %v270_v34, %v270_v34  ;;  %v200_v47 = vpack.i.b16 %v168_v35, %v168_v35 }
  0x3e   :  { %1141 = vmatpush3.bf16.msra.mxu0 %v560_v54  ;;  %1175 = vmatpush3.bf16.msra.mxu1 %v576_v62  ;;  %v500_v48 = vpack.i.b16 %v302_v40, %v302_v40  ;;  %v290_v51 = vrot.slane %v192_v41, %v1434_v27  ;;  %v188_v52 = vpack.i.b16 %v156_v2, %v156_v2  ;;  %v164_v54 = vunpack.i.h.s16 %v1538_v49 }
  0x3f   :  { %1142 = vmatprep.subr.bf16.mxu0 %v569_v5  ;;  %1176 = vmatprep.subr.bf16.mxu1 %v585_v21  ;;  %v477_v53 = vrot.slane %v472_v42, %v1434_v27  ;;  %v528_v55 = vpack.i.b16 %v318_v43, %v318_v43  ;;  %v1584_v56 = vrot.slane %v444_v44, %v1434_v27 }
  0x40   :  { %v479_v57 = vpack.i.b16 %v290_v51, %v290_v51  ;;  %v322_v58 = vrot.slane %v200_v47, %v1434_v27  ;;  %v274_v59 = vrot.slane %v188_v52, %v1434_v27  ;;  %v562_v60 = vmul.bf16 %v1559_v3, %v1411_v15 }
  0x41   :  { %v533_v61 = vrot.slane %v528_v55, %v1434_v27  ;;  %v1593_v45 = vrot.slane %v500_v48, %v1434_v27  ;;  %v1115_v62 = vcombine.low %v1430_v25, %v1432_v26  ;;  %v578_v1 = vmul.bf16 %v414_v22, %v1411_v15 }
  0x42   :  { %1143 = vmatpush3.bf16.msra.mxu0 %v561_v46  ;;  %1177 = vmatpush3.bf16.msra.mxu1 %v577_v39  ;;  %v595_v2 = vmul.bf16 %v477_v53, %v1396_v10  ;;  %v587_v49 = vmul.bf16 %v1584_v56, %v1396_v10  ;;  %v596_v63 = vmul.bf16 %v477_v53, %v1411_v15 }
  0x43   :  { %1144 = vmatprep.subr.bf16.mxu0 %v570_v11  ;;  %1178 = vmatprep.subr.bf16.mxu1 %v586_v23  ;;  %v611_v3 = vmul.bf16 %v533_v61, %v1396_v10  ;;  %v1604_v0 = vrot.slane %v479_v57, %v1434_v27  ;;  %v535_v4 = vpack.i.b16 %v322_v58, %v322_v58  ;;  %v636_v57 = vld [vmem:[#allocation3 + $0x88] sm:$0x11] }
  0x44   :  { %v451_v5 = vpack.i.b16 %v274_v59, %v274_v59  ;;  %v196_v16 = vpack.i.b16 %v164_v54, %v164_v54  ;;  %v105_v19 = vcombine.high %v1442_v30, %v1442_v30  ;;  %v603_v21 = vmul.bf16 %v1593_v45, %v1396_v10 }
  0x45   :  { %v588_v11 = vmul.bf16 %v1584_v56, %v1411_v15  ;;  %v604_v22 = vmul.bf16 %v1593_v45, %v1411_v15  ;;  %v106_v23 = vcombine.high %v1451_v36, %v1451_v36  ;;  %v612_v32 = vmul.bf16 %v533_v61, %v1411_v15 }
  0x46   :  { %1145 = vmatpush3.bf16.msra.mxu0 %v562_v60  ;;  %1179 = vmatpush3.bf16.msra.mxu1 %v578_v1  ;;  %v1620_v30 = vrot.slane %v535_v4, %v1434_v27  ;;  %v306_v33 = vrot.slane %v196_v16, %v1434_v27  ;;  %v1624_v34 = vrot.slane %v451_v5, %v1434_v27 }
  0x47   :  { %1198 = vmatprep.subr.bf16.mxu0 %v595_v2  ;;  %1232 = vmatprep.subr.bf16.mxu1 %v611_v3  ;;  %v127_v35 = vrot.slane %v105_v19, %v1377_v6  ;;  %v1628_v36 = vrot.slane %v106_v23, %v1377_v6  ;;  %v597_v46 = vmul.bf16 %v1604_v0, %v1396_v10  ;;  %v621_v19 = vld [vmem:[#allocation3 + $0x10] sm:$0xff] }
  0x48   :  { %v507_v39 = vpack.i.b16 %v306_v33, %v306_v33  ;;  %v598_v40 = vmul.bf16 %v1604_v0, %v1411_v15  ;;  %v1122_v41 = vcombine.high %v1616_v31, %v1616_v31  ;;  %v613_v6 = vmul.bf16 %v1620_v30, %v1396_v10  ;;  %v626_v33 = vld [vmem:[#allocation3 + $0x38] sm:$0xff] }
  0x49   :  { %780 = vmatmul.mubr.bf16.vlgmr.msra.gmra.mrb[0].mxu0 %v1105_v28  ;;  %836 = vmatmul.mubr.bf16.vlgmr.msra.gmra.mrb[0].mxu1 %v1107_v29  ;;  %v137_v42 = vcombine.high %v127_v35, %v127_v35  ;;  %v138_v43 = vcombine.high %v1628_v36, %v1628_v36  ;;  %v1098_v47 = vpack.i.b16 %v127_v35, %v127_v35  ;;  %v158_v52 = vunpack.i.h.s16 %v127_v35 }
  0x4a   :  { %1199 = vmatpush3.bf16.msra.mxu0 %v587_v49  ;;  %1233 = vmatpush3.bf16.msra.mxu1 %v603_v21  ;;  %v1647_v44 = vrot.slane %v507_v39, %v1434_v27  ;;  %v1102_v13 = vpack.i.b16 %v1628_v36, %v1628_v36  ;;  %v589_v14 = vmul.bf16 %v1624_v34, %v1396_v10  ;;  %v166_v4 = vunpack.i.h.s16 %v1628_v36 }
  0x4b   :  { %1200 = vmatprep.subr.bf16.mxu0 %v596_v63  ;;  %1234 = vmatprep.subr.bf16.mxu1 %v612_v32  ;;  %v1100_v17 = vpack.i.b16 %v137_v42, %v137_v42  ;;  %v1104_v18 = vpack.i.b16 %v138_v43, %v138_v43  ;;  %v162_v28 = vunpack.i.h.s16 %v137_v42  ;;  %v614_v29 = vmul.bf16 %v1620_v30, %v1411_v15  ;;  %v625_v32 = vld [vmem:[#allocation3 + $0x30] sm:$0xff]  ;;  %v622_v30 = vld [vmem:[#allocation3 + $0x18] sm:$0xff] }
  0x4c   :  { %787 = vmatprep.mubr.bf16.mxu0 %v1114_v37  ;;  %843 = vmatprep.mubr.bf16.mxu1 %v1116_v38  ;;  %v278_v48 = vrot.slane %v1098_v47, %v1434_v27  ;;  %v170_v51 = vunpack.i.h.s16 %v138_v43  ;;  %v605_v53 = vmul.bf16 %v1647_v44, %v1396_v10  ;;  %v310_v37 = vrot.slane %v1102_v13, %v1434_v27 }
  0x4d   :  { %v294_v55 = vrot.slane %v1100_v17, %v1434_v27  ;;  %v326_v56 = vrot.slane %v1104_v18, %v1434_v27  ;;  %v194_v58 = vpack.i.b16 %v162_v28, %v162_v28  ;;  %v1124_v1 = vcombine.high %v636_v57, %v636_v57 }
  0x4e   :  { %1201 = vmatpush3.bf16.msra.mxu0 %v588_v11  ;;  %1235 = vmatpush3.bf16.msra.mxu1 %v604_v22  ;;  %v458_v38 = vpack.i.b16 %v278_v48, %v278_v48  ;;  %v202_v59 = vpack.i.b16 %v170_v51, %v170_v51  ;;  %v514_v61 = vpack.i.b16 %v310_v37, %v310_v37 }
  0x4f   :  { %1202 = vmatprep.subr.bf16.mxu0 %v597_v46  ;;  %1236 = vmatprep.subr.bf16.mxu1 %v613_v6  ;;  %v486_v54 = vpack.i.b16 %v294_v55, %v294_v55  ;;  %v542_v60 = vpack.i.b16 %v326_v56, %v326_v56  ;;  %v298_v2 = vrot.slane %v194_v58, %v1434_v27  ;;  %v630_v55 = vld [vmem:[#allocation3 + $0x58] sm:$0xff]  ;;  %v637_v58 = vld [vmem:[#allocation3 + $0x90] sm:$0x11] }
  0x50   :  { %v463_v45 = vrot.slane %v458_v38, %v1434_v27  ;;  %v330_v49 = vrot.slane %v202_v59, %v1434_v27  ;;  %v190_v0 = vpack.i.b16 %v158_v52, %v158_v52  ;;  %v590_v5 = vmul.bf16 %v1624_v34, %v1411_v15  ;;  %v629_v52 = vld [vmem:[#allocation3 + $0x50] sm:$0xff]  ;;  %v634_v56 = vld [vmem:[#allocation3 + $0x78] sm:$0xff] }
  0x51   :  { %788 = vmatmul.mubr.bf16.gmra.mrb[4].mxu0 %v1113_v50  ;;  %844 = vmatmul.mubr.bf16.gmra.mrb[4].mxu1 %v1115_v62  ;;  %v491_v3 = vrot.slane %v486_v54, %v1434_v27  ;;  %v547_v63 = vrot.slane %v542_v60, %v1434_v27  ;;  %v606_v20 = vmul.bf16 %v1647_v44, %v1411_v15  ;;  %v638_v59 = vld [vmem:[#allocation3 + $0x98] sm:$0x11] }
  0x52   :  { %1203 = vmatpush3.bf16.msra.mxu0 %v589_v14  ;;  %1237 = vmatpush3.bf16.msra.mxu1 %v605_v53  ;;  %v519_v24 = vrot.slane %v514_v61, %v1434_v27  ;;  %v493_v50 = vpack.i.b16 %v298_v2, %v298_v2  ;;  %v1121_v62 = vcombine.low %v1616_v31, %v1616_v31  ;;  %v633_v53 = vld [vmem:[#allocation3 + $0x70] sm:$0xff]  ;;  %v1336_v2 = vmov 0.0|0.0  }
  0x53   :  { %1204 = vmatprep.subr.bf16.mxu0 %v598_v40  ;;  %1238 = vmatprep.subr.bf16.mxu1 %v614_v29  ;;  %v599_v25 = vmul.bf16 %v491_v3, %v1396_v10  ;;  %v615_v26 = vmul.bf16 %v547_v63, %v1396_v10  ;;  %v1123_v16 = vcombine.low %v636_v57, %v636_v57 }
  0x54   :  { %795 = vmatprep.mubr.bf16.mxu0 %v1122_v41  ;;  %851 = vmatprep.mubr.bf16.mxu1 %v1124_v1  ;;  %v591_v21 = vmul.bf16 %v463_v45, %v1396_v10  ;;  %v549_v11 = vpack.i.b16 %v330_v49, %v330_v49  ;;  %v282_v22 = vrot.slane %v190_v0, %v1434_v27  ;;  %v1338_v49 = vmov 0.0  }
  0x55   :  { %v198_v23 = vpack.i.b16 %v166_v4, %v166_v4  ;;  %v607_v34 = vmul.bf16 %v519_v24, %v1396_v10  ;;  %v600_v35 = vmul.bf16 %v491_v3, %v1411_v15  ;;  %v616_v31 = vmul.bf16 %v547_v63, %v1411_v15 }
  0x56   :  { %1205 = vmatpush3.bf16.msra.mxu0 %v590_v5  ;;  %1239 = vmatpush3.bf16.msra.mxu1 %v606_v20  ;;  %v498_v36 = vrot.slane %v493_v50, %v1434_v27  ;;  %v554_v46 = vrot.slane %v549_v11, %v1434_v27  ;;  %v465_v39 = vpack.i.b16 %v282_v22, %v282_v22 }
  0x57   :  { %1206 = vmatprep.subr.bf16.mxu0 %v599_v25  ;;  %1240 = vmatprep.subr.bf16.mxu1 %v615_v26  ;;  %v314_v40 = vrot.slane %v198_v23, %v1434_v27  ;;  %v1110_v41 = vcombine.high %v621_v19, %v625_v32  ;;  %v1112_v6 = vcombine.high %v622_v30, %v626_v33 }
  0x58   :  { %v592_v42 = vmul.bf16 %v463_v45, %v1411_v15  ;;  %v608_v43 = vmul.bf16 %v519_v24, %v1411_v15  ;;  %v470_v44 = vrot.slane %v465_v39, %v1434_v27  ;;  %v601_v13 = vmul.bf16 %v498_v36, %v1396_v10 }
  0x59   :  { %796 = vmatmul.mubr.bf16.gmra.mrb[8].mxu0 %v1121_v62  ;;  %852 = vmatmul.mubr.bf16.gmra.mrb[8].mxu1 %v1123_v16  ;;  %v521_v47 = vpack.i.b16 %v314_v40, %v314_v40  ;;  %v617_v14 = vmul.bf16 %v554_v46, %v1396_v10  ;;  %v602_v29 = vmul.bf16 %v498_v36, %v1411_v15 }
  0x5a   :  { %1207 = vmatpush3.bf16.msra.mxu0 %v591_v21  ;;  %1241 = vmatpush3.bf16.msra.mxu1 %v607_v34  ;;  %v593_v18 = vmul.bf16 %v470_v44, %v1396_v10  ;;  %v618_v48 = vmul.bf16 %v554_v46, %v1411_v15  ;;  %v594_v51 = vmul.bf16 %v470_v44, %v1411_v15 }
  0x5b   :  { %1208 = vmatprep.subr.bf16.mxu0 %v600_v35  ;;  %1242 = vmatprep.subr.bf16.mxu1 %v616_v31  ;;  %v526_v17 = vrot.slane %v521_v47, %v1434_v27  ;;  %v1109_v37 = vcombine.low %v621_v19, %v625_v32  ;;  %v1118_v57 = vcombine.high %v629_v52, %v633_v53 }
  0x5c   :  { %891 = vmatprep.mubr.bf16.mxu0 %v1110_v41  ;;  %947 = vmatprep.mubr.bf16.mxu1 %v1112_v6  ;;  %v1120_v38 = vcombine.high %v630_v55, %v634_v56  ;;  %v1117_v54 = vcombine.low %v629_v52, %v633_v53  ;;  %v1126_v60 = vcombine.high %v637_v58, %v637_v58 }
  0x5d   :  { %v609_v28 = vmul.bf16 %v526_v17, %v1396_v10  ;;  %v610_v27 = vmul.bf16 %v526_v17, %v1411_v15  ;;  %v1111_v10 = vcombine.low %v622_v30, %v626_v33  ;;  %v1119_v15 = vcombine.low %v630_v55, %v634_v56 }
  0x5e   :  { %1209 = vmatpush3.bf16.msra.mxu0 %v592_v42  ;;  %1243 = vmatpush3.bf16.msra.mxu1 %v608_v43  ;;  %v1128_v61 = vcombine.high %v638_v59, %v638_v59  ;;  %v1125_v45 = vcombine.low %v637_v58, %v637_v58  ;;  %v1127_v1 = vcombine.low %v638_v59, %v638_v59 }
  0x5f   :  { %1210 = vmatprep.subr.bf16.mxu0 %v601_v13  ;;  %1244 = vmatprep.subr.bf16.mxu1 %v617_v14 }
  0x62   :  { %1211 = vmatpush3.bf16.msra.mxu0 %v593_v18  ;;  %1245 = vmatpush3.bf16.msra.mxu1 %v609_v28 }
  0x63   :  { %1212 = vmatprep.subr.bf16.mxu0 %v602_v29  ;;  %1246 = vmatprep.subr.bf16.mxu1 %v618_v48 }
  0x66   :  { %1213 = vmatpush3.bf16.msra.mxu0 %v594_v51  ;;  %1247 = vmatpush3.bf16.msra.mxu1 %v610_v27 }
  0x67   :  { %1282 = vmatprep.subr.bf16.mxu0 %v1336_v2 }
  0x69   :  { %892 = vmatmul.mubr.bf16.vlgmr.msra.gmra.mrb[12].mxu0 %v1109_v37  ;;  %948 = vmatmul.mubr.bf16.vlgmr.msra.gmra.mrb[12].mxu1 %v1111_v10 }
  0x6a   :  { %899 = vmatprep.mubr.bf16.mxu0 %v1118_v57  ;;  %955 = vmatprep.mubr.bf16.mxu1 %v1120_v38 }
  0x71   :  { %900 = vmatmul.mubr.bf16.gmra.mrb[16].mxu0 %v1117_v54  ;;  %956 = vmatmul.mubr.bf16.gmra.mrb[16].mxu1 %v1119_v15 }
  0x72   :  { %907 = vmatprep.mubr.bf16.mxu0 %v1126_v60  ;;  %963 = vmatprep.mubr.bf16.mxu1 %v1128_v61 }
  0x79   :  { %908 = vmatmul.mubr.bf16.gmra.mrb[20].mxu0 %v1125_v45  ;;  %964 = vmatmul.mubr.bf16.gmra.mrb[20].mxu1 %v1127_v1 }
  0x7a   :  { %1279 = vmatprep.mubr.msk.f32.mxu0 %vm1337_vm0, %v1338_v49 }
  0x94   :  { %v988_v45 = vpop.permute.xlu1 %987 }
  0x98   :  { %v978_v48 = vpop.permute.xlu0 %977 }
  0x9c   :  { %v983_v61 = vpop.permute.xlu0 %982 }
 0x11c   :  { %v1146_v3 = vpop.f32.mrb[0].mxu0  ;;  %v1180_v63 = vpop.f32.mrb[0].mxu1 }
 0x11d   :  { %v1147_v0 = vpop.f32.mrb[1].mxu0  ;;  %v1181_v4 = vpop.f32.mrb[1].mxu1 }
 0x11e   :  { %v1148_v5 = vadd.f32 %v1147_v0, %v1146_v3  ;;  %v1182_v20 = vadd.f32 %v1181_v4, %v1180_v63  ;;  %v1149_v24 = vpop.f32.mrb[2].mxu0  ;;  %v1183_v25 = vpop.f32.mrb[2].mxu1 }
 0x11f   :  { %v1150_v26 = vpop.f32.mrb[3].mxu0  ;;  %v1184_v50 = vpop.f32.mrb[3].mxu1 }
 0x120   :  { %v838_v62 = vadd.f32 %v1182_v20, %v1148_v5  ;;  %v1151_v16 = vadd.f32 %v1150_v26, %v1149_v24  ;;  %v1185_v19 = vadd.f32 %v1184_v50, %v1183_v25 }
 0x122   :  { %v841_v21 = vadd.f32 %v1185_v19, %v1151_v16 }
 0x124   :  { %v1152_v11 = vpop.f32.mrb[4].mxu0  ;;  %v1186_v22 = vpop.f32.mrb[4].mxu1 }
 0x125   :  { %v1153_v23 = vpop.f32.mrb[5].mxu0  ;;  %v1187_v32 = vpop.f32.mrb[5].mxu1 }
 0x126   :  { %v1154_v30 = vadd.f32 %v1153_v23, %v1152_v11  ;;  %v1188_v33 = vadd.f32 %v1187_v32, %v1186_v22  ;;  %v1155_v34 = vpop.f32.mrb[6].mxu0  ;;  %v1189_v35 = vpop.f32.mrb[6].mxu1 }
 0x127   :  { %v1156_v31 = vpop.f32.mrb[7].mxu0  ;;  %v1190_v36 = vpop.f32.mrb[7].mxu1 }
 0x128   :  { %v846_v46 = vadd.f32 %v1188_v33, %v1154_v30  ;;  %v1157_v39 = vadd.f32 %v1156_v31, %v1155_v34  ;;  %v1191_v40 = vadd.f32 %v1190_v36, %v1189_v35  ;;  %v993_v33 = vpop.permute.xlu1 %992 }
 0x12a   :  { %v849_v41 = vadd.f32 %v1191_v40, %v1157_v39 }
 0x12c   :  { %v1158_v6 = vpop.f32.mrb[8].mxu0  ;;  %v1192_v42 = vpop.f32.mrb[8].mxu1 }
 0x12d   :  { %v1159_v43 = vpop.f32.mrb[9].mxu0  ;;  %v1193_v44 = vpop.f32.mrb[9].mxu1 }
 0x12e   :  { %v1160_v47 = vadd.f32 %v1159_v43, %v1158_v6  ;;  %v1161_v13 = vpop.f32.mrb[10].mxu0  ;;  %v1194_v14 = vadd.f32 %v1193_v44, %v1192_v42  ;;  %v1195_v17 = vpop.f32.mrb[10].mxu1 }
 0x12f   :  { %v1162_v18 = vpop.f32.mrb[11].mxu0  ;;  %v1196_v28 = vpop.f32.mrb[11].mxu1 }
 0x130   :  { %v854_v29 = vadd.f32 %v1194_v14, %v1160_v47  ;;  %v1339_v18 = vmov 1.0  }
 0x13c   :  { %v1214_v51 = vpop.f32.mrb[12].mxu0  ;;  %v1248_v27 = vpop.f32.mrb[12].mxu1 }
 0x13d   :  { %v1215_v52 = vpop.f32.mrb[13].mxu0  ;;  %v1249_v53 = vpop.f32.mrb[13].mxu1 }
 0x13e   :  { %v1216_v55 = vadd.f32 %v1215_v52, %v1214_v51  ;;  %v1250_v56 = vadd.f32 %v1249_v53, %v1248_v27  ;;  %v1217_v37 = vpop.f32.mrb[14].mxu0  ;;  %v1251_v10 = vpop.f32.mrb[14].mxu1 }
 0x13f   :  { %v1218_v57 = vpop.f32.mrb[15].mxu0  ;;  %v1252_v38 = vpop.f32.mrb[15].mxu1 }
 0x140   :  { %v894_v58 = vadd.f32 %v1216_v55, %v838_v62  ;;  %v1219_v59 = vadd.f32 %v1218_v57, %v1217_v37  ;;  %v1253_v54 = vadd.f32 %v1252_v38, %v1251_v10 }
 0x142   :  { %v950_v15 = vadd.f32 %v1250_v56, %v894_v58  ;;  %v897_v60 = vadd.f32 %v1219_v59, %v841_v21 }
 0x144   :  { %v995_v1 = vadd.f32 %v978_v48, %v950_v15  ;;  %v953_v49 = vadd.f32 %v1253_v54, %v897_v60  ;;  %v1220_v3 = vpop.f32.mrb[16].mxu0  ;;  %v1254_v63 = vpop.f32.mrb[16].mxu1 }
 0x145   :  { %v1221_v0 = vpop.f32.mrb[17].mxu0  ;;  %v1255_v4 = vpop.f32.mrb[17].mxu1 }
 0x146   :  { %v996_v5 = vadd.f32 %v983_v61, %v953_v49  ;;  %v1222_v20 = vadd.f32 %v1221_v0, %v1220_v3  ;;  %v1223_v24 = vpop.f32.mrb[18].mxu0  ;;  %v1256_v25 = vadd.f32 %v1255_v4, %v1254_v63  ;;  %v1257_v26 = vpop.f32.mrb[18].mxu1  ;;  %v999_v50 = vmul.f32 %v995_v1, %v1382_v7 }
 0x147   :  { %v1224_v62 = vpop.f32.mrb[19].mxu0  ;;  %v1258_v16 = vpop.f32.mrb[19].mxu1 }
 0x148   :  { %v1000_v19 = vmul.f32 %v996_v5, %v1387_v8  ;;  %v902_v21 = vadd.f32 %v1222_v20, %v846_v46  ;;  %v1225_v11 = vadd.f32 %v1224_v62, %v1223_v24  ;;  %v1259_v22 = vadd.f32 %v1258_v16, %v1257_v26 }
 0x14a   :  { %v1283_v23 = vpack.c.bf16 %v1000_v19, %v999_v50  ;;  %v905_v32 = vadd.f32 %v1225_v11, %v849_v41  ;;  %v958_v30 = vadd.f32 %v1256_v25, %v902_v21 }
 0x14c   :  { %v997_v34 = vadd.f32 %v988_v45, %v958_v30  ;;  %v1226_v35 = vpop.f32.mrb[20].mxu0  ;;  %1284 = vmatpush3.bf16.msra.mxu0 %v1283_v23  ;;  %v961_v31 = vadd.f32 %v1259_v22, %v905_v32  ;;  %v1260_v36 = vpop.f32.mrb[20].mxu1 }
 0x14d   :  { %v1227_v39 = vpop.f32.mrb[21].mxu0  ;;  %v1261_v40 = vpop.f32.mrb[21].mxu1  ;;  %1285 = vmatprep.subr.bf16.mxu0 %v1336_v2  ;;  %v1078_v2 = vstv %s1720_s0 }
 0x14e   :  { %v998_v7 = vadd.f32 %v993_v33, %v961_v31  ;;  %v1228_v6 = vadd.f32 %v1227_v39, %v1226_v35  ;;  %v1262_v42 = vadd.f32 %v1261_v40, %v1260_v36  ;;  %v1229_v8 = vpop.f32.mrb[22].mxu0  ;;  %v1263_v46 = vpop.f32.mrb[22].mxu1  ;;  %v1001_v41 = vmul.f32 %v997_v34, %v1392_v9 }
 0x14f   :  { %v1230_v43 = vpop.f32.mrb[23].mxu0  ;;  %v1264_v44 = vpop.f32.mrb[23].mxu1 }
 0x150   :  { %v1002_v47 = vmul.f32 %v998_v7, %v1403_v12  ;;  %v910_v13 = vadd.f32 %v1228_v6, %v854_v29 }
 0x152   :  { %v1286_v14 = vpack.c.bf16 %v1002_v47, %v1001_v41  ;;  %v966_v17 = vadd.f32 %v1262_v42, %v910_v13 }
 0x154   :  { %1287 = vmatpush3.bf16.msra.mxu0 %v1286_v14  ;;  %v1079_v28 = vadd.f32 %v1078_v2, %v966_v17 }
 0x157   :  { %1280 = vmatmul.mubr.msk.f32.vlgmr.msra.gmra.mrb[24].mxu0 %vm1003_vm1, %v1339_v18 }
 0x22a   :  { %v1073_v48 = vpop.f32.mrb[24].mxu0 }
 0x22b   :  { %v1080_v51 = vadd.f32 %v1079_v28, %v1073_v48  ;;  %v1281_v27 = vpop.f32.mrb[25].mxu0 }
 0x22d   :  { %1081 = vst [vmem:[%s1724_s4] sm:$0x1] %v1080_v51 }
 0x22e   :  { %1086 = vsyncpa [#allocation4], 1 }

</bundles_post_ra>
